<compile_context>
chip_gen: v7x
topology: tpu7x:2x2x1
jax: 0.10.0
libtpu: 0.0.40
codegen_flags: <defaults>
</compile_context>

<pallas_src>
import functools

import jax
import jax.numpy as jnp
from jax.experimental import pallas as pl
from jax.experimental.pallas import tpu as pltpu

PATCH = 4            # patch-embed stride / kernel
DIM = 128            # hidden width, lane-dense
HEAD_PAD = 128       # head output padded to a full vreg lane width
NUM_CLASSES = 1
COND_DIM = 4         # SUM conditions on a 4-way domain one-hot
NUM_BLOCKS = 2
MAX_TM = 2048        # token-tile cap (fits all gens with explicit vmem limit)

assert HEAD_PAD == DIM  # packed-vector rows share one width


# ----------------------------------------------------------------------------- fused kernel

def _sum_fused_kernel(num_blocks, tok_ref, cond_ref, vecs_ref, patch_w_ref, *rest):
    """Full forward for one (sample, token-tile): patch embed -> blocks -> head.

    rest = (w_in_0, w_out_0, ..., w_in_{nb-1}, w_out_{nb-1}, head_w, o_ref)
    vecs rows: [(ln_g, ln_b) x nb, head_ln_g, head_ln_b, head_bias, zero-pad...]
    """
    blk_refs = rest[: 2 * num_blocks]
    head_w_ref = rest[2 * num_blocks]
    o_ref = rest[2 * num_blocks + 1]

    vecs = vecs_ref[...]                      # (8, 128) f32 — one VMEM tile
    tok = tok_ref[0]                          # (TM, K_in) bf16
    cond = cond_ref[0]                        # (1, DIM)  f32; patch bias folded in

    def layer_norm(h, g, b):
        # NOTE: jnp.mean(axis=-1) is a cross-lane (XLU) reduce; if a bundle dump
        # shows XLU binding on v6e/v7x this could be moved to the (idle) MXU via
        # a matmul against a ones column.  Kept simple / f32-exact here.
        mu = jnp.mean(h, axis=-1, keepdims=True)
        var = jnp.mean((h - mu) ** 2, axis=-1, keepdims=True)
        return (h - mu) * jax.lax.rsqrt(var + 1e-5) * g + b

    # patch embed + (condition embedding + patch bias), single broadcast add
    h = jnp.dot(tok, patch_w_ref[...], preferred_element_type=jnp.float32) + cond

    # Simplified VSS blocks: LayerNorm -> gated (SiLU) channel mixer -> residual.
    # TODO(synk): the real SS2D 4-direction selective scan has no clean Pallas
    # equivalent at this size; it is replaced by a gated token-wise mixer.
    for i in range(num_blocks):
        g = vecs[2 * i: 2 * i + 1, :]
        b = vecs[2 * i + 1: 2 * i + 2, :]
        hn = layer_norm(h, g, b)
        gv = jnp.dot(hn.astype(jnp.bfloat16), blk_refs[2 * i][...],
                     preferred_element_type=jnp.float32)
        gate, val = gv[:, :DIM], gv[:, DIM:]          # exact vreg-boundary slices
        y = jax.nn.silu(gate) * val
        h = h + jnp.dot(y.astype(jnp.bfloat16), blk_refs[2 * i + 1][...],
                        preferred_element_type=jnp.float32)

    # head: final norm -> padded per-token projection -> sigmoid (num_classes==1)
    rg = 2 * num_blocks
    hn = layer_norm(h, vecs[rg: rg + 1, :], vecs[rg + 1: rg + 2, :])
    logits = jnp.dot(hn.astype(jnp.bfloat16), head_w_ref[...],
                     preferred_element_type=jnp.float32) + vecs[rg + 2: rg + 3, :]
    # lane-dense (TM, 128) bf16 store (2x smaller writeback than f32)
    o_ref[0] = jax.nn.sigmoid(logits).astype(o_ref.dtype)


# ----------------------------------------------------------------------------- params

def init_params(key):
    def nrm(k, shape, scale=0.02):
        return scale * jax.random.normal(k, shape, jnp.float32)

    keys = jax.random.split(key, 3 + 2 * NUM_BLOCKS)
    kin3 = PATCH * PATCH * 3
    pp = PATCH * PATCH * NUM_CLASSES

    # f32 master; folded (for 1-ch inputs) and cast to bf16 in the wrapper
    patch_w = nrm(keys[0], (kin3, DIM))
    patch_b = jnp.zeros((DIM,), jnp.float32)
    cond_w = nrm(keys[1], (COND_DIM, DIM))
    head_w = jnp.zeros((DIM, HEAD_PAD), jnp.float32)
    head_w = head_w.at[:, :pp].set(nrm(keys[2], (DIM, pp))).astype(jnp.bfloat16)

    block_w = []
    for i in range(NUM_BLOCKS):
        k0, k1 = keys[3 + 2 * i], keys[4 + 2 * i]
        block_w.append((nrm(k0, (DIM, 2 * DIM)).astype(jnp.bfloat16),
                        nrm(k1, (DIM, DIM)).astype(jnp.bfloat16)))

    # Pack all tiny per-layer vectors into one (8, 128) f32 slab.
    rows = []
    for _ in range(NUM_BLOCKS):
        rows += [jnp.ones((DIM,), jnp.float32),        # ln gamma
                 jnp.zeros((DIM,), jnp.float32)]       # ln beta
    rows += [jnp.ones((DIM,), jnp.float32),            # head ln gamma
             jnp.zeros((DIM,), jnp.float32),           # head ln beta
             jnp.zeros((HEAD_PAD,), jnp.float32)]      # head bias (zero-padded)
    rows += [jnp.zeros((DIM,), jnp.float32)] * ((-len(rows)) % 8)
    vecs = jnp.stack(rows, axis=0)                     # (8, 128)

    return {"patch_w": patch_w, "patch_b": patch_b, "cond_w": cond_w,
            "head_w": head_w, "block_w": block_w, "vecs": vecs}


# ----------------------------------------------------------------------------- tiling helper

def _pick_tm(T, B, max_tm=MAX_TM):
    """Largest token-tile that (a) divides T, (b) is sublane-aligned (mult. of 8),
    (c) fits the VMEM budget, and (d) keeps the combined parallel grid
    non-degenerate (>=2 steps, even when possible) so both v7x TCs are used."""
    cands = [d for d in range(8, min(T, max_tm) + 1, 8) if T % d == 0]
    if not cands:
        cands = [T]                                     # tiny T: one whole-T tile
    even = [d for d in cands if (B * (T // d)) >= 2 and (B * (T // d)) % 2 == 0]
    pool = even if even else cands
    return max(pool)


# ----------------------------------------------------------------------------- forward

def sum_forward(params, x, condition):
    """SUM.forward: (implicit channel repeat) -> fused VSSM(x, condition) -> sigmoid."""
    B, C, H, W = x.shape
    assert H % PATCH == 0 and W % PATCH == 0
    hp, wp = H // PATCH, W // PATCH
    T = hp * wp

    # Fold the 1ch->3ch repeat into the patch weight: sum the 3 per-channel
    # column blocks.  Exactly equivalent to x.repeat(1,3,1,1) @ patch_w, but
    # skips the 3x HBM materialization and shrinks k_in 48 -> 16.
    patch_w = params["patch_w"]
    if C == 1:
        patch_w = patch_w.reshape(PATCH * PATCH, 3, DIM).sum(axis=1)
    patch_w = patch_w.astype(jnp.bfloat16)
    k_in = PATCH * PATCH * C

    # Cast BEFORE the im2col relayout so the HBM->HBM transpose moves bf16.
    x = x.astype(jnp.bfloat16)
    tokens = x.reshape(B, C, hp, PATCH, wp, PATCH)
    tokens = tokens.transpose(0, 2, 4, 3, 5, 1).reshape(B, T, k_in)

    # tiny (B,4)@(4,128) condition embedding stays in XLA; patch bias folded in
    # here so the kernel does a single broadcast add.  Broadcast over tokens
    # happens INSIDE the kernel (no materialized (n, D) cond_tok).
    cond_emb = (condition.astype(jnp.float32) @ params["cond_w"]
                + params["patch_b"][None, :]).reshape(B, 1, DIM)

    TM = _pick_tm(T, B)
    assert T % TM == 0
    grid = (B, T // TM)

    weight_args = [patch_w]
    for w_in, w_out in params["block_w"]:
        weight_args += [w_in, w_out]
    weight_args.append(params["head_w"])

    def const2d(a):          # constant index map -> fetched once by the pipeline
        return pl.BlockSpec(a.shape, lambda b, t: (0, 0))

    out_tok = pl.pallas_call(
        functools.partial(_sum_fused_kernel, NUM_BLOCKS),
        out_shape=jax.ShapeDtypeStruct((B, T, HEAD_PAD), jnp.bfloat16),
        grid=grid,
        in_specs=[
            pl.BlockSpec((1, TM, k_in), lambda b, t: (b, t, 0)),   # tokens
            pl.BlockSpec((1, 1, DIM), lambda b, t: (b, 0, 0)),     # cond embedding
            const2d(params["vecs"]),                               # packed small vectors
            *[const2d(w) for w in weight_args],                    # VMEM-resident weights
        ],
        out_specs=pl.BlockSpec((1, TM, HEAD_PAD), lambda b, t: (b, t, 0)),
        compiler_params=pltpu.CompilerParams(
            dimension_semantics=("parallel", "parallel"),
            vmem_limit_bytes=48 * 1024 * 1024),      # TM=2048 live VMEM ~10-12 MiB
    )(tokens, cond_emb, params["vecs"], *weight_args)

    # drop zero-padded lanes; tokens -> NCHW full-resolution saliency map
    out = out_tok[:, :, : PATCH * PATCH * NUM_CLASSES].astype(jnp.float32)
    out = out.reshape(B, hp, wp, PATCH, PATCH, NUM_CLASSES)
    out = out.transpose(0, 5, 1, 3, 2, 4).reshape(B, NUM_CLASSES, H, W)
    return out


# ----------------------------------------------------------------------------- main

if __name__ == "__main__":
    key = jax.random.PRNGKey(0)
    kx, kp = jax.random.split(key, 2)

    B, H, W = 2, 16, 16
    # 1-channel input exercises the x.repeat(1, 3, 1, 1) branch of SUM.forward
    x = jax.random.normal(kx, (B, 1, H, W), jnp.float32)
    # SUM's `condition`: 4-way domain one-hot per sample
    condition = jax.nn.one_hot(jnp.array([0, 2]), COND_DIM, dtype=jnp.float32)

    params = init_params(kp)
    fwd = jax.jit(sum_forward)
    out = fwd(params, x, condition)
    out = jax.block_until_ready(out)

    assert out.shape == (B, NUM_CLASSES, H, W), out.shape
    assert bool(jnp.all((out >= 0.0) & (out <= 1.0)))  # sigmoid output
    print("KERNEL_OK")
</pallas_src>

<mosaic_0001>
module attributes {stable_mosaic.version = 11 : i64} {
  func.func @_sum_fused_kernel(%arg0: i32, %arg1: i32, %arg2: memref<1x16x16xbf16, #tpu.memory_space<vmem>>, %arg3: memref<1x1x128xf32, #tpu.memory_space<vmem>>, %arg4: memref<8x128xf32, #tpu.memory_space<vmem>>, %arg5: memref<16x128xbf16, #tpu.memory_space<vmem>>, %arg6: memref<128x256xbf16, #tpu.memory_space<vmem>>, %arg7: memref<128x128xbf16, #tpu.memory_space<vmem>>, %arg8: memref<128x256xbf16, #tpu.memory_space<vmem>>, %arg9: memref<128x128xbf16, #tpu.memory_space<vmem>>, %arg10: memref<128x128xbf16, #tpu.memory_space<vmem>>, %arg11: memref<1x16x128xbf16, #tpu.memory_space<vmem>>) attributes {dimension_semantics = [#tpu.dimension_semantics<parallel>, #tpu.dimension_semantics<parallel>], iteration_bounds = array<i64: 2, 1>, scalar_prefetch = 0 : i64, scratch_operands = 0 : i64, tpu.core_type = #tpu.core_type<tc>, window_params = [{transform_indices = @transform_0, window_bounds = array<i64: 1, 16, 16>}, {transform_indices = @transform_1, window_bounds = array<i64: 1, 1, 128>}, {pipeline_mode = #tpu.pipeline_mode<synchronous>, transform_indices = @transform_2, window_bounds = array<i64: 8, 128>}, {pipeline_mode = #tpu.pipeline_mode<synchronous>, transform_indices = @transform_3, window_bounds = array<i64: 16, 128>}, {pipeline_mode = #tpu.pipeline_mode<synchronous>, transform_indices = @transform_4, window_bounds = array<i64: 128, 256>}, {pipeline_mode = #tpu.pipeline_mode<synchronous>, transform_indices = @transform_5, window_bounds = array<i64: 128, 128>}, {pipeline_mode = #tpu.pipeline_mode<synchronous>, transform_indices = @transform_6, window_bounds = array<i64: 128, 256>}, {pipeline_mode = #tpu.pipeline_mode<synchronous>, transform_indices = @transform_7, window_bounds = array<i64: 128, 128>}, {pipeline_mode = #tpu.pipeline_mode<synchronous>, transform_indices = @transform_8, window_bounds = array<i64: 128, 128>}, {transform_indices = @transform_9, window_bounds = array<i64: 1, 16, 128>}]} {
    %c0 = arith.constant 0 : index
    %c0_0 = arith.constant 0 : index
    %0 = vector.load %arg4[%c0, %c0_0] : memref<8x128xf32, #tpu.memory_space<vmem>>, vector<8x128xf32>
    %c0_1 = arith.constant 0 : index
    %c0_2 = arith.constant 0 : index
    %c0_3 = arith.constant 0 : index
    %1 = vector.load %arg2[%c0_1, %c0_2, %c0_3] : memref<1x16x16xbf16, #tpu.memory_space<vmem>>, vector<1x16x16xbf16>
    %2 = vector.shape_cast %1 : vector<1x16x16xbf16> to vector<16x16xbf16>
    %c0_4 = arith.constant 0 : index
    %c0_5 = arith.constant 0 : index
    %c0_6 = arith.constant 0 : index
    %3 = vector.load %arg3[%c0_4, %c0_5, %c0_6] : memref<1x1x128xf32, #tpu.memory_space<vmem>>, vector<1x1x128xf32>
    %4 = vector.shape_cast %3 : vector<1x1x128xf32> to vector<1x128xf32>
    %c0_7 = arith.constant 0 : index
    %c0_8 = arith.constant 0 : index
    %5 = vector.load %arg5[%c0_7, %c0_8] : memref<16x128xbf16, #tpu.memory_space<vmem>>, vector<16x128xbf16>
    %cst = arith.constant dense<0.000000e+00> : vector<16x128xf32>
    %6 = tpu.matmul %2, %5, %cst {dimension_numbers = #tpu.dot_dimension_numbers<[1], [0], [0], [1], [0, 0, 1, 1], [], []>} : vector<16x16xbf16>, vector<16x128xbf16>, vector<16x128xf32> -> vector<16x128xf32>
    %7 = vector.broadcast %4 : vector<1x128xf32> to vector<16x128xf32>
    %8 = arith.addf %6, %7 : vector<16x128xf32>
    %9 = vector.extract_strided_slice %0 {offsets = [0, 0], sizes = [1, 128], strides = [1, 1]} : vector<8x128xf32> to vector<1x128xf32>
    %10 = vector.extract_strided_slice %0 {offsets = [1, 0], sizes = [1, 128], strides = [1, 1]} : vector<8x128xf32> to vector<1x128xf32>
    %cst_9 = arith.constant dense<0.000000e+00> : vector<16xf32>
    %11 = vector.multi_reduction <add>, %8, %cst_9 [1] : vector<16x128xf32> to vector<16xf32>
    %12 = vector.shape_cast %11 : vector<16xf32> to vector<16x1xf32>
    %cst_10 = arith.constant 1.280000e+02 : f32
    %13 = vector.broadcast %cst_10 : f32 to vector<16x1xf32>
    %14 = arith.divf %12, %13 : vector<16x1xf32>
    %15 = vector.broadcast %14 : vector<16x1xf32> to vector<16x128xf32>
    %16 = arith.subf %8, %15 : vector<16x128xf32>
    %17 = arith.mulf %16, %16 : vector<16x128xf32>
    %cst_11 = arith.constant dense<0.000000e+00> : vector<16xf32>
    %18 = vector.multi_reduction <add>, %17, %cst_11 [1] : vector<16x128xf32> to vector<16xf32>
    %19 = vector.shape_cast %18 : vector<16xf32> to vector<16x1xf32>
    %cst_12 = arith.constant 1.280000e+02 : f32
    %20 = vector.broadcast %cst_12 : f32 to vector<16x1xf32>
    %21 = arith.divf %19, %20 : vector<16x1xf32>
    %22 = vector.broadcast %14 : vector<16x1xf32> to vector<16x128xf32>
    %23 = arith.subf %8, %22 : vector<16x128xf32>
    %cst_13 = arith.constant 9.99999974E-6 : f32
    %24 = vector.broadcast %cst_13 : f32 to vector<16x1xf32>
    %25 = arith.addf %21, %24 : vector<16x1xf32>
    %26 = math.rsqrt %25 : vector<16x1xf32>
    %27 = vector.broadcast %26 : vector<16x1xf32> to vector<16x128xf32>
    %28 = arith.mulf %23, %27 : vector<16x128xf32>
    %29 = vector.broadcast %9 : vector<1x128xf32> to vector<16x128xf32>
    %30 = arith.mulf %28, %29 : vector<16x128xf32>
    %31 = vector.broadcast %10 : vector<1x128xf32> to vector<16x128xf32>
    %32 = arith.addf %30, %31 : vector<16x128xf32>
    %33 = arith.truncf %32 : vector<16x128xf32> to vector<16x128xbf16>
    %c0_14 = arith.constant 0 : index
    %c0_15 = arith.constant 0 : index
    %34 = vector.load %arg6[%c0_14, %c0_15] : memref<128x256xbf16, #tpu.memory_space<vmem>>, vector<128x256xbf16>
    %cst_16 = arith.constant dense<0.000000e+00> : vector<16x256xf32>
    %35 = tpu.matmul %33, %34, %cst_16 {dimension_numbers = #tpu.dot_dimension_numbers<[1], [0], [0], [1], [0, 0, 1, 1], [], []>} : vector<16x128xbf16>, vector<128x256xbf16>, vector<16x256xf32> -> vector<16x256xf32>
    %36 = vector.extract_strided_slice %35 {offsets = [0, 0], sizes = [16, 128], strides = [1, 1]} : vector<16x256xf32> to vector<16x128xf32>
    %37 = vector.extract_strided_slice %35 {offsets = [0, 128], sizes = [16, 128], strides = [1, 1]} : vector<16x256xf32> to vector<16x128xf32>
    %38 = arith.negf %36 : vector<16x128xf32>
    %39 = math.exp %38 : vector<16x128xf32>
    %cst_17 = arith.constant 1.000000e+00 : f32
    %40 = vector.broadcast %cst_17 : f32 to vector<16x128xf32>
    %41 = arith.addf %40, %39 : vector<16x128xf32>
    %42 = arith.divf %40, %41 : vector<16x128xf32>
    %43 = arith.mulf %36, %42 : vector<16x128xf32>
    %44 = arith.mulf %43, %37 : vector<16x128xf32>
    %45 = arith.truncf %44 : vector<16x128xf32> to vector<16x128xbf16>
    %c0_18 = arith.constant 0 : index
    %c0_19 = arith.constant 0 : index
    %46 = vector.load %arg7[%c0_18, %c0_19] : memref<128x128xbf16, #tpu.memory_space<vmem>>, vector<128x128xbf16>
    %cst_20 = arith.constant dense<0.000000e+00> : vector<16x128xf32>
    %47 = tpu.matmul %45, %46, %cst_20 {dimension_numbers = #tpu.dot_dimension_numbers<[1], [0], [0], [1], [0, 0, 1, 1], [], []>} : vector<16x128xbf16>, vector<128x128xbf16>, vector<16x128xf32> -> vector<16x128xf32>
    %48 = arith.addf %8, %47 : vector<16x128xf32>
    %49 = vector.extract_strided_slice %0 {offsets = [2, 0], sizes = [1, 128], strides = [1, 1]} : vector<8x128xf32> to vector<1x128xf32>
    %50 = vector.extract_strided_slice %0 {offsets = [3, 0], sizes = [1, 128], strides = [1, 1]} : vector<8x128xf32> to vector<1x128xf32>
    %cst_21 = arith.constant dense<0.000000e+00> : vector<16xf32>
    %51 = vector.multi_reduction <add>, %48, %cst_21 [1] : vector<16x128xf32> to vector<16xf32>
    %52 = vector.shape_cast %51 : vector<16xf32> to vector<16x1xf32>
    %cst_22 = arith.constant 1.280000e+02 : f32
    %53 = vector.broadcast %cst_22 : f32 to vector<16x1xf32>
    %54 = arith.divf %52, %53 : vector<16x1xf32>
    %55 = vector.broadcast %54 : vector<16x1xf32> to vector<16x128xf32>
    %56 = arith.subf %48, %55 : vector<16x128xf32>
    %57 = arith.mulf %56, %56 : vector<16x128xf32>
    %cst_23 = arith.constant dense<0.000000e+00> : vector<16xf32>
    %58 = vector.multi_reduction <add>, %57, %cst_23 [1] : vector<16x128xf32> to vector<16xf32>
    %59 = vector.shape_cast %58 : vector<16xf32> to vector<16x1xf32>
    %cst_24 = arith.constant 1.280000e+02 : f32
    %60 = vector.broadcast %cst_24 : f32 to vector<16x1xf32>
    %61 = arith.divf %59, %60 : vector<16x1xf32>
    %62 = vector.broadcast %54 : vector<16x1xf32> to vector<16x128xf32>
    %63 = arith.subf %48, %62 : vector<16x128xf32>
    %cst_25 = arith.constant 9.99999974E-6 : f32
    %64 = vector.broadcast %cst_25 : f32 to vector<16x1xf32>
    %65 = arith.addf %61, %64 : vector<16x1xf32>
    %66 = math.rsqrt %65 : vector<16x1xf32>
    %67 = vector.broadcast %66 : vector<16x1xf32> to vector<16x128xf32>
    %68 = arith.mulf %63, %67 : vector<16x128xf32>
    %69 = vector.broadcast %49 : vector<1x128xf32> to vector<16x128xf32>
    %70 = arith.mulf %68, %69 : vector<16x128xf32>
    %71 = vector.broadcast %50 : vector<1x128xf32> to vector<16x128xf32>
    %72 = arith.addf %70, %71 : vector<16x128xf32>
    %73 = arith.truncf %72 : vector<16x128xf32> to vector<16x128xbf16>
    %c0_26 = arith.constant 0 : index
    %c0_27 = arith.constant 0 : index
    %74 = vector.load %arg8[%c0_26, %c0_27] : memref<128x256xbf16, #tpu.memory_space<vmem>>, vector<128x256xbf16>
    %cst_28 = arith.constant dense<0.000000e+00> : vector<16x256xf32>
    %75 = tpu.matmul %73, %74, %cst_28 {dimension_numbers = #tpu.dot_dimension_numbers<[1], [0], [0], [1], [0, 0, 1, 1], [], []>} : vector<16x128xbf16>, vector<128x256xbf16>, vector<16x256xf32> -> vector<16x256xf32>
    %76 = vector.extract_strided_slice %75 {offsets = [0, 0], sizes = [16, 128], strides = [1, 1]} : vector<16x256xf32> to vector<16x128xf32>
    %77 = vector.extract_strided_slice %75 {offsets = [0, 128], sizes = [16, 128], strides = [1, 1]} : vector<16x256xf32> to vector<16x128xf32>
    %78 = arith.negf %76 : vector<16x128xf32>
    %79 = math.exp %78 : vector<16x128xf32>
    %cst_29 = arith.constant 1.000000e+00 : f32
    %80 = vector.broadcast %cst_29 : f32 to vector<16x128xf32>
    %81 = arith.addf %80, %79 : vector<16x128xf32>
    %82 = arith.divf %80, %81 : vector<16x128xf32>
    %83 = arith.mulf %76, %82 : vector<16x128xf32>
    %84 = arith.mulf %83, %77 : vector<16x128xf32>
    %85 = arith.truncf %84 : vector<16x128xf32> to vector<16x128xbf16>
    %c0_30 = arith.constant 0 : index
    %c0_31 = arith.constant 0 : index
    %86 = vector.load %arg9[%c0_30, %c0_31] : memref<128x128xbf16, #tpu.memory_space<vmem>>, vector<128x128xbf16>
    %cst_32 = arith.constant dense<0.000000e+00> : vector<16x128xf32>
    %87 = tpu.matmul %85, %86, %cst_32 {dimension_numbers = #tpu.dot_dimension_numbers<[1], [0], [0], [1], [0, 0, 1, 1], [], []>} : vector<16x128xbf16>, vector<128x128xbf16>, vector<16x128xf32> -> vector<16x128xf32>
    %88 = arith.addf %48, %87 : vector<16x128xf32>
    %89 = vector.extract_strided_slice %0 {offsets = [4, 0], sizes = [1, 128], strides = [1, 1]} : vector<8x128xf32> to vector<1x128xf32>
    %90 = vector.extract_strided_slice %0 {offsets = [5, 0], sizes = [1, 128], strides = [1, 1]} : vector<8x128xf32> to vector<1x128xf32>
    %cst_33 = arith.constant dense<0.000000e+00> : vector<16xf32>
    %91 = vector.multi_reduction <add>, %88, %cst_33 [1] : vector<16x128xf32> to vector<16xf32>
    %92 = vector.shape_cast %91 : vector<16xf32> to vector<16x1xf32>
    %cst_34 = arith.constant 1.280000e+02 : f32
    %93 = vector.broadcast %cst_34 : f32 to vector<16x1xf32>
    %94 = arith.divf %92, %93 : vector<16x1xf32>
    %95 = vector.broadcast %94 : vector<16x1xf32> to vector<16x128xf32>
    %96 = arith.subf %88, %95 : vector<16x128xf32>
    %97 = arith.mulf %96, %96 : vector<16x128xf32>
    %cst_35 = arith.constant dense<0.000000e+00> : vector<16xf32>
    %98 = vector.multi_reduction <add>, %97, %cst_35 [1] : vector<16x128xf32> to vector<16xf32>
    %99 = vector.shape_cast %98 : vector<16xf32> to vector<16x1xf32>
    %cst_36 = arith.constant 1.280000e+02 : f32
    %100 = vector.broadcast %cst_36 : f32 to vector<16x1xf32>
    %101 = arith.divf %99, %100 : vector<16x1xf32>
    %102 = vector.broadcast %94 : vector<16x1xf32> to vector<16x128xf32>
    %103 = arith.subf %88, %102 : vector<16x128xf32>
    %cst_37 = arith.constant 9.99999974E-6 : f32
    %104 = vector.broadcast %cst_37 : f32 to vector<16x1xf32>
    %105 = arith.addf %101, %104 : vector<16x1xf32>
    %106 = math.rsqrt %105 : vector<16x1xf32>
    %107 = vector.broadcast %106 : vector<16x1xf32> to vector<16x128xf32>
    %108 = arith.mulf %103, %107 : vector<16x128xf32>
    %109 = vector.broadcast %89 : vector<1x128xf32> to vector<16x128xf32>
    %110 = arith.mulf %108, %109 : vector<16x128xf32>
    %111 = vector.broadcast %90 : vector<1x128xf32> to vector<16x128xf32>
    %112 = arith.addf %110, %111 : vector<16x128xf32>
    %113 = arith.truncf %112 : vector<16x128xf32> to vector<16x128xbf16>
    %c0_38 = arith.constant 0 : index
    %c0_39 = arith.constant 0 : index
    %114 = vector.load %arg10[%c0_38, %c0_39] : memref<128x128xbf16, #tpu.memory_space<vmem>>, vector<128x128xbf16>
    %cst_40 = arith.constant dense<0.000000e+00> : vector<16x128xf32>
    %115 = tpu.matmul %113, %114, %cst_40 {dimension_numbers = #tpu.dot_dimension_numbers<[1], [0], [0], [1], [0, 0, 1, 1], [], []>} : vector<16x128xbf16>, vector<128x128xbf16>, vector<16x128xf32> -> vector<16x128xf32>
    %116 = vector.extract_strided_slice %0 {offsets = [6, 0], sizes = [1, 128], strides = [1, 1]} : vector<8x128xf32> to vector<1x128xf32>
    %117 = vector.broadcast %116 : vector<1x128xf32> to vector<16x128xf32>
    %118 = arith.addf %115, %117 : vector<16x128xf32>
    %119 = arith.negf %118 : vector<16x128xf32>
    %120 = math.exp %119 : vector<16x128xf32>
    %cst_41 = arith.constant 1.000000e+00 : f32
    %121 = vector.broadcast %cst_41 : f32 to vector<16x128xf32>
    %122 = arith.addf %121, %120 : vector<16x128xf32>
    %123 = arith.divf %121, %122 : vector<16x128xf32>
    %124 = arith.truncf %123 : vector<16x128xf32> to vector<16x128xbf16>
    %c0_42 = arith.constant 0 : index
    %c0_43 = arith.constant 0 : index
    %c0_44 = arith.constant 0 : index
    %125 = vector.load %arg11[%c0_42, %c0_43, %c0_44] : memref<1x16x128xbf16, #tpu.memory_space<vmem>>, vector<1x16x128xbf16>
    %126 = vector.shape_cast %125 : vector<1x16x128xbf16> to vector<16x128xbf16>
    %127 = vector.shape_cast %124 : vector<16x128xbf16> to vector<1x16x128xbf16>
    tpu.vector_store %arg11[%c0_42, %c0_43, %c0_44], %127 {strides = array<i32>} : memref<1x16x128xbf16, #tpu.memory_space<vmem>>, vector<1x16x128xbf16>,
    return
  }
  func.func @transform_0(%arg0: i32, %arg1: i32) -> (i32, i32, i32) {
    %c0_i32 = arith.constant 0 : i32
    %c0_i32_0 = arith.constant 0 : i32
    return %arg0, %arg1, %c0_i32 : i32, i32, i32
  }
  func.func @transform_1(%arg0: i32, %arg1: i32) -> (i32, i32, i32) {
    %c0_i32 = arith.constant 0 : i32
    %c0_i32_0 = arith.constant 0 : i32
    %c0_i32_1 = arith.constant 0 : i32
    return %arg0, %c0_i32, %c0_i32_0 : i32, i32, i32
  }
  func.func @transform_2(%arg0: i32, %arg1: i32) -> (i32, i32) {
    %c0_i32 = arith.constant 0 : i32
    %c0_i32_0 = arith.constant 0 : i32
    %c0_i32_1 = arith.constant 0 : i32
    return %c0_i32, %c0_i32_0 : i32, i32
  }
  func.func @transform_3(%arg0: i32, %arg1: i32) -> (i32, i32) {
    %c0_i32 = arith.constant 0 : i32
    %c0_i32_0 = arith.constant 0 : i32
    %c0_i32_1 = arith.constant 0 : i32
    return %c0_i32, %c0_i32_0 : i32, i32
  }
  func.func @transform_4(%arg0: i32, %arg1: i32) -> (i32, i32) {
    %c0_i32 = arith.constant 0 : i32
    %c0_i32_0 = arith.constant 0 : i32
    %c0_i32_1 = arith.constant 0 : i32
    return %c0_i32, %c0_i32_0 : i32, i32
  }
  func.func @transform_5(%arg0: i32, %arg1: i32) -> (i32, i32) {
    %c0_i32 = arith.constant 0 : i32
    %c0_i32_0 = arith.constant 0 : i32
    %c0_i32_1 = arith.constant 0 : i32
    return %c0_i32, %c0_i32_0 : i32, i32
  }
  func.func @transform_6(%arg0: i32, %arg1: i32) -> (i32, i32) {
    %c0_i32 = arith.constant 0 : i32
    %c0_i32_0 = arith.constant 0 : i32
    %c0_i32_1 = arith.constant 0 : i32
    return %c0_i32, %c0_i32_0 : i32, i32
  }
  func.func @transform_7(%arg0: i32, %arg1: i32) -> (i32, i32) {
    %c0_i32 = arith.constant 0 : i32
    %c0_i32_0 = arith.constant 0 : i32
    %c0_i32_1 = arith.constant 0 : i32
    return %c0_i32, %c0_i32_0 : i32, i32
  }
  func.func @transform_8(%arg0: i32, %arg1: i32) -> (i32, i32) {
    %c0_i32 = arith.constant 0 : i32
    %c0_i32_0 = arith.constant 0 : i32
    %c0_i32_1 = arith.constant 0 : i32
    return %c0_i32, %c0_i32_0 : i32, i32
  }
  func.func @transform_9(%arg0: i32, %arg1: i32) -> (i32, i32, i32) {
    %c0_i32 = arith.constant 0 : i32
    %c0_i32_0 = arith.constant 0 : i32
    return %arg0, %arg1, %c0_i32 : i32, i32, i32
  }
}

</mosaic_0001>

<bundles_post_ra>
// kernel: sum_forward.1
= control target key start
LH: loop header
LB: loop body
LE: loop exit
PB: predicated region body
PF: predicated region fallthrough
CT: control target
= control target key end

     0   :  { %s1711_s30 = smov 0   ;;  %s1713_s10 = smov 0   ;;  %s2000_s0 = inlined_call_operand.vmem [shape: bf16[2,16,16], index: 0, kind: input, shape index: {}]   ;;  %s2001_s1 = inlined_call_operand.vmem [shape: f32[2,1,128], index: 1, kind: input, shape index: {}]   ;;  %s2002_s2 = inlined_call_operand.vmem [shape: f32[8,128], index: 2, kind: input, shape index: {}]   ;;  %s2003_s3 = inlined_call_operand.vmem [shape: bf16[16,128], index: 3, kind: input, shape index: {}]   ;;  %s2004_s4 = inlined_call_operand.vmem [shape: bf16[128,256], index: 4, kind: input, shape index: {}]   ;;  %s2005_s5 = inlined_call_operand.vmem [shape: bf16[128,128], index: 5, kind: input, shape index: {}]   ;;  %s2006_s6 = inlined_call_operand.vmem [shape: bf16[128,256], index: 6, kind: input, shape index: {}]   ;;  %s2007_s7 = inlined_call_operand.vmem [shape: bf16[128,128], index: 7, kind: input, shape index: {}]   ;;  %s2008_s8 = inlined_call_operand.vmem [shape: bf16[128,128], index: 8, kind: input, shape index: {}]   ;;  %s2009_s9 = inlined_call_operand.vmem [shape: bf16[2,16,128], index: 9, kind: output, shape index: {}]  }
   0x1   :  { %s1715_s11 = smov 0  }
   0x2 LB: > { %s31_s12 = sadd.s32 1, %s1652_s10  ;;  %p1318_p0 = scmp.ge.s32.totalorder %s1656_s11, 1  ;;  %s1656_s11 = sphi %s1715_s11, %s19_s11   ;;  %s1652_s10 = sphi %s1713_s10, %s2011_s10   ;;  %s1648_s30 = sphi %s1711_s30, %s2010_s30  }
   0x3   : > { %p33_p1 = scmp.ge.s32.totalorder %s31_s12, 2  ;;  %p316_p2 = scmp.lt.s32.totalorder %s1656_s11, 3 }
   0x5   : > { %s2013_s12 = smov (%p33_p1, %s31_s12), 0  ;;  %p317_p3 = pnand %p1318_p0, %p316_p2 }
   0x6   : > { %v1524_v0 = vld [vmem:[%s2003_s3] sm:$0xff] (!%p317_p3)   ;;  %v1658_v1 = vmov (!%p317_p3), 0.0   ;;  %p364_p4 = scmp.lt.s32.totalorder (!%p317_p3), %s1648_s30, 1  ;;  %vm1659_vm0 = vmmov (!%p317_p3), 0   ;;  %vm410_vm1 = vcmask (!%p317_p3), 130048   ;;  %v1660_v29 = vmov (!%p317_p3), 0  }
   0x7   : > { %320 = sbr.rel (%p317_p3) target bundleno = 2344 (0x928), region = 56  ;;  %1431 = vmatprep.subr.bf16.mxu0 (!%p317_p3), %v1658_v1  ;;  %1433 = vmatprep.mubr.msk.bf16.mxu0 (!%p317_p3), %vm1659_vm0, %v1658_v1  ;;  %v1526_v10 = vld [vmem:[%s2004_s4 + $0x4] ss:$8 sps:$4 sm:$0xff] (!%p317_p3)   ;;  %v1528_v11 = vld [vmem:[%s2004_s4] ss:$8 sps:$4 sm:$0xff] (!%p317_p3)   ;;  %v478_v39 = vlaneseq (!%p317_p3)  ;;  %v1552_v59 = vld [vmem:[%s2005_s5 + $0x10] sm:$0xff] (!%p317_p3)  }
   0x8   : > { %1432 = vmatpush3.bf16.msra.mxu0 (!%p317_p3), %v1524_v0  ;;  %v1529_v12 = vld [vmem:[%s2004_s4 + $0x14] ss:$8 sps:$4 sm:$0xff] (!%p317_p3)   ;;  %587 = vmatprep.subr.bf16.mxu1 (!%p317_p3), %v1526_v10  ;;  %v1531_v21 = vld [vmem:[%s2004_s4 + $0x10] ss:$8 sps:$4 sm:$0xff] (!%p317_p3)   ;;  %v1532_v22 = vld [vmem:[%s2004_s4 + $0x24] ss:$8 sps:$4 sm:$0xff] (!%p317_p3)  }
   0x9   : > { %1437 = vmatprep.subr.bf16.mxu0 (!%p317_p3), %v1658_v1  ;;  %588 = vmatpush1.bf16.msra.mxu1 (!%p317_p3), %v1528_v11  ;;  %v1534_v23 = vld [vmem:[%s2004_s4 + $0x20] ss:$8 sps:$4 sm:$0xff] (!%p317_p3)   ;;  %v1535_v24 = vld [vmem:[%s2004_s4 + $0x34] ss:$8 sps:$4 sm:$0xff] (!%p317_p3)   ;;  %v1537_v25 = vld [vmem:[%s2004_s4 + $0x30] ss:$8 sps:$4 sm:$0xff] (!%p317_p3)  }
   0xa   : > { %589 = vmatprep.subr.bf16.mxu1 (!%p317_p3), %v1529_v12  ;;  %v1538_v26 = vld [vmem:[%s2004_s4 + $0x44] ss:$8 sps:$4 sm:$0xff] (!%p317_p3)   ;;  %v1540_v27 = vld [vmem:[%s2004_s4 + $0x40] ss:$8 sps:$4 sm:$0xff] (!%p317_p3)   ;;  %v1541_v28 = vld [vmem:[%s2004_s4 + $0x54] ss:$8 sps:$4 sm:$0xff] (!%p317_p3)   ;;  %619 = vmatprep.mubr.bf16.mxu1 (!%p317_p3), %v1660_v29 }
   0xb   : > { %v1543_v30 = vld [vmem:[%s2004_s4 + $0x50] ss:$8 sps:$4 sm:$0xff] (!%p317_p3)   ;;  %v1544_v31 = vld [vmem:[%s2004_s4 + $0x64] ss:$8 sps:$4 sm:$0xff] (!%p317_p3)   ;;  %v1546_v32 = vld [vmem:[%s2004_s4 + $0x60] ss:$8 sps:$4 sm:$0xff] (!%p317_p3)  }
   0xc   : > { %v1547_v33 = vld [vmem:[%s2004_s4 + $0x74] ss:$8 sps:$4 sm:$0xff] (!%p317_p3)   ;;  %v1549_v34 = vld [vmem:[%s2004_s4 + $0x70] ss:$8 sps:$4 sm:$0xff] (!%p317_p3)   ;;  %v1806_v42 = vshrl.u32 (!%p317_p3), %v478_v39, 7  ;;  %v1812_v44 = vld [vmem:[%s2002_s2] sm:$0xff] (!%p317_p3) }
   0xd   : > { %590 = vmatpush1.bf16.msra.mxu1 (!%p317_p3), %v1531_v21  ;;  %v1550_v57 = vld [vmem:[%s2005_s5] sm:$0xff] (!%p317_p3)   ;;  %v1551_v58 = vld [vmem:[%s2005_s5 + $0x8] sm:$0xff] (!%p317_p3)   ;;  %v1553_v60 = vld [vmem:[%s2005_s5 + $0x18] sm:$0xff] (!%p317_p3)  }
   0xe   : > { %s2015_s30 = smov (!%p364_p4, %s1648_s30), 1  ;;  %591 = vmatprep.subr.bf16.mxu1 %v1532_v22  ;;  %v480_v43 = vsub.s32 0, %v1806_v42  ;;  %v486_v48 = vsub.s32 1, %v1806_v42  ;;  %v1554_v61 = vld [vmem:[%s2005_s5 + $0x20] sm:$0xff]   ;;  %v1555_v62 = vld [vmem:[%s2005_s5 + $0x28] sm:$0xff]   ;;  %v1556_v63 = vld [vmem:[%s2005_s5 + $0x30] sm:$0xff]  }
   0xf   : > { %s1393_s15 = sshll.u32 %s2015_s30, 3  ;;  %s375_s21 = scalar_lea.vmem %s2001_s1, %s2015_s30  ;;  %v1557_v0 = vld [vmem:[%s2005_s5 + $0x38] sm:$0xff]  }
  0x10   : > { %s371_s18 = scalar_lea.vmem %s2000_s0, %s1393_s15  ;;  %v1323_v3 = vld [vmem:[%s375_s21] ss:$0 sm:$0xff]  ;;  %v481_v47 = vrot.slane %v1812_v44, %v480_v43  ;;  %v487_v52 = vrot.slane %v1812_v44, %v486_v48  ;;  %v1569_v39 = vld [vmem:[%s2006_s6 + $0x34] ss:$8 sps:$4 sm:$0xff]   ;;  %s384_s26 = scalar_lea.vmem %s2009_s9, %s1393_s15 }
  0x11   : > { %v1525_v2 = vld [vmem:[%s371_s18] sm:$0xff]   ;;  %592 = vmatpush1.bf16.msra.mxu1 %v1534_v23 }
  0x12   : > { %1434 = vmatmul.mubr.msk.bf16.vlgmr.msra.gmra.mrb[0].mxu0 %vm410_vm1, %v1525_v2  ;;  %593 = vmatprep.subr.bf16.mxu1 %v1535_v24  ;;  %v1570_v43 = vld [vmem:[%s2006_s6 + $0x40] ss:$8 sps:$4 sm:$0xff]  }
  0x13   : > { %1453 = vmatprep.mubr.msk.bf16.mxu0 %vm1659_vm0, %v1658_v1  ;;  %1438 = vmatpush3.bf16.msra.mxu0 %v1550_v57  ;;  %v1576_v48 = vld [vmem:[%s2006_s6 + $0x60] ss:$8 sps:$4 sm:$0xff]   ;;  %v778_v57 = vsub.s32 2, %v1806_v42 }
  0x14   : > { %1439 = vmatprep.subr.bf16.mxu0 %v1658_v1 }
  0x15   : > { %594 = vmatpush1.bf16.msra.mxu1 %v1537_v25 }
  0x16   : > { %595 = vmatprep.subr.bf16.mxu1 %v1538_v26 }
  0x17   : > { %1440 = vmatpush3.bf16.msra.mxu0 %v1551_v58  ;;  %v779_v58 = vrot.slane %v1812_v44, %v778_v57 }
  0x18   : > { %1441 = vmatprep.subr.bf16.mxu0 %v1658_v1 }
  0x19   : > { %596 = vmatpush1.bf16.msra.mxu1 %v1540_v27  ;;  %v1558_v27 = vld [vmem:[%s2006_s6] ss:$8 sps:$4 sm:$0xff]  }
  0x1a   : > { %597 = vmatprep.subr.bf16.mxu1 %v1541_v28  ;;  %v1560_v28 = vld [vmem:[%s2006_s6 + $0x4] ss:$8 sps:$4 sm:$0xff]  }
  0x1b   : > { %1442 = vmatpush3.bf16.msra.mxu0 %v1552_v59  ;;  %v784_v59 = vsub.s32 3, %v1806_v42 }
  0x1c   : > { %1443 = vmatprep.subr.bf16.mxu0 %v1658_v1 }
  0x1d   : > { %598 = vmatpush1.bf16.msra.mxu1 %v1543_v30 }
  0x1e   : > { %599 = vmatprep.subr.bf16.mxu1 %v1544_v31 }
  0x1f   : > { %1444 = vmatpush3.bf16.msra.mxu0 %v1553_v60 }
  0x20   : > { %1445 = vmatprep.subr.bf16.mxu0 %v1658_v1 }
  0x21   : > { %600 = vmatpush1.bf16.msra.mxu1 %v1546_v32 }
  0x22   : > { %601 = vmatprep.subr.bf16.mxu1 %v1547_v33 }
  0x23   : > { %1446 = vmatpush3.bf16.msra.mxu0 %v1554_v61 }
  0x24   : > { %1447 = vmatprep.subr.bf16.mxu0 %v1658_v1 }
  0x25   : > { %602 = vmatpush1.bf16.msra.mxu1 %v1549_v34 }
  0x26   : > { %885 = vmatprep.subr.bf16.mxu1 %v1560_v28 }
  0x27   : > { %1448 = vmatpush3.bf16.msra.mxu0 %v1555_v62 }
  0x28   : > { %1449 = vmatprep.subr.bf16.mxu0 %v1658_v1 }
  0x2b   : > { %1450 = vmatpush3.bf16.msra.mxu0 %v1556_v63 }
  0x2c   : > { %1451 = vmatprep.subr.bf16.mxu0 %v1658_v1 }
  0x2f   : > { %1452 = vmatpush3.bf16.msra.mxu0 %v1557_v0 }
  0x30   : > { %1457 = vmatprep.subr.bf16.mxu0 %v1658_v1 }
  0xe5   : > { %v448_v4 = vpop.f32.mrb[0].mxu0 }
  0xe6   : > { %v1750_v5 = vadd.f32 %v1323_v3, %v448_v4  ;;  %v1435_v6 = vpop.f32.mrb[1].mxu0 }
  0xe7   : > { %v451_v7 = vpop.f32.mrb[2].mxu0 }
  0xe8   : > { %v1752_v8 = vadd.f32 %v1323_v3, %v451_v7  ;;  %455 = vadd.xlane.f32.xlu0 %v1750_v5  ;;  %v1436_v9 = vpop.f32.mrb[3].mxu0 }
  0xec   : > { %457 = vadd.xlane.f32.xlu0 %v1752_v8 }
 0x175   : > { %v456_v13 = vpop.xlane.xlu0 %455 }
 0x176   : > { %v460_v14 = vmul.f32 0.0078125, %v456_v13 }
 0x178   : > { %v462_v15 = vsub.f32 %v1750_v5, %v460_v14 }
 0x179   : > { %v458_v16 = vpop.xlane.xlu0 %457 }
 0x17a   : > { %v461_v17 = vmul.f32 0.0078125, %v458_v16  ;;  %v464_v18 = vmul.f32 %v462_v15, %v462_v15 }
 0x17c   : > { %v463_v19 = vsub.f32 %v1752_v8, %v461_v17  ;;  %466 = vadd.xlane.f32.xlu1 %v464_v18 }
 0x17e   : > { %v465_v20 = vmul.f32 %v463_v19, %v463_v19 }
 0x180   : > { %468 = vadd.xlane.f32.xlu1 %v465_v20 }
 0x209   : > { %v467_v35 = vpop.xlane.xlu1 %466 }
 0x20a   : > { %v470_v36 = vmul.f32 0.0078125, %v467_v35 }
 0x20c   : > { %v472_v37 = vadd.f32 1e-05, %v470_v36 }
 0x20d   : > { %v469_v38 = vpop.xlane.xlu1 %468 }
 0x20e   : > { %1598 = vrsqrt.f32 %v472_v37  ;;  %v471_v40 = vmul.f32 0.0078125, %v469_v38  ;;  %v1566_v37 = vld [vmem:[%s2006_s6 + $0x24] ss:$8 sps:$4 sm:$0xff]   ;;  %v1564_v38 = vld [vmem:[%s2006_s6 + $0x20] ss:$8 sps:$4 sm:$0xff]  }
 0x210   : > { %v473_v41 = vadd.f32 1e-05, %v471_v40  ;;  %v1567_v40 = vld [vmem:[%s2006_s6 + $0x30] ss:$8 sps:$4 sm:$0xff]  }
 0x212   : > { %1600 = vrsqrt.f32 %v473_v41  ;;  %v1572_v41 = vld [vmem:[%s2006_s6 + $0x44] ss:$8 sps:$4 sm:$0xff]  }
 0x218   : > { %v1599_v45 = vpop.eup %1598 }
 0x219   : > { %v476_v46 = vmul.f32 %v1599_v45, %v462_v15  ;;  %v1575_v45 = vld [vmem:[%s2006_s6 + $0x54] ss:$8 sps:$4 sm:$0xff]  }
 0x21b   : > { %v482_v51 = vmul.f32 %v481_v47, %v476_v46  ;;  %v1573_v46 = vld [vmem:[%s2006_s6 + $0x50] ss:$8 sps:$4 sm:$0xff]  }
 0x21c   : > { %v1601_v49 = vpop.eup %1600 }
 0x21d   : > { %v477_v50 = vmul.f32 %v1601_v49, %v463_v19  ;;  %v488_v54 = vadd.f32 %v487_v52, %v482_v51  ;;  %v1581_v49 = vld [vmem:[%s2006_s6 + $0x74] ss:$8 sps:$4 sm:$0xff]  }
 0x21f   : > { %v483_v53 = vmul.f32 %v481_v47, %v477_v50  ;;  %v1578_v47 = vld [vmem:[%s2006_s6 + $0x64] ss:$8 sps:$4 sm:$0xff]   ;;  %v1579_v50 = vld [vmem:[%s2006_s6 + $0x70] ss:$8 sps:$4 sm:$0xff]  }
 0x221   : > { %v489_v55 = vadd.f32 %v487_v52, %v483_v53 }
 0x223   : > { %v490_v56 = vpack.c.bf16 %v489_v55, %v488_v54 }
 0x225   : > { %620 = vmatmul.mubr.bf16.vlgmr.msra.gmra.mrb[0].mxu1 %v490_v56 }
 0x226   : > { %917 = vmatprep.mubr.bf16.mxu1 %v1660_v29  ;;  %886 = vmatpush1.bf16.msra.mxu1 %v1558_v27 }
 0x2f8   : > { %v621_v2 = vpop.f32.mrb[0].mxu1 }
 0x2f9   : > { %v1343_v3 = vmul.f32 -1.442695, %v621_v2  ;;  %v623_v4 = vpop.f32.mrb[1].mxu1 }
 0x2fa   : > { %v625_v6 = vpop.f32.mrb[2].mxu1 }
 0x2fb   : > { %1602 = vpow2.f32 %v1343_v3  ;;  %v1344_v7 = vmul.f32 -1.442695, %v625_v6  ;;  %v627_v9 = vpop.f32.mrb[3].mxu1 }
 0x2fd   : > { %1604 = vpow2.f32 %v1344_v7 }
 0x305   : > { %v1603_v10 = vpop.eup %1602 }
 0x306   : > { %v636_v11 = vadd.f32 1.0, %v1603_v10  ;;  %v1583_v10 = vld [vmem:[%s2007_s7 + $0x8] sm:$0xff]  }
 0x307   : > { %v1605_v12 = vpop.eup %1604 }
 0x308   : > { %1606 = vrcp.f32 %v636_v11  ;;  %v637_v13 = vadd.f32 1.0, %v1605_v12  ;;  %v1584_v11 = vld [vmem:[%s2007_s7 + $0x10] sm:$0xff]   ;;  %v1585_v12 = vld [vmem:[%s2007_s7 + $0x18] sm:$0xff]  }
 0x30a   : > { %1608 = vrcp.f32 %v637_v13  ;;  %v1586_v13 = vld [vmem:[%s2007_s7 + $0x20] sm:$0xff]  }
 0x312   : > { %v1607_v14 = vpop.eup %1606 }
 0x313   : > { %v642_v15 = vmul.f32 %v1607_v14, %v621_v2  ;;  %v785_v2 = vrot.slane %v1812_v44, %v784_v59  ;;  %v1587_v14 = vld [vmem:[%s2007_s7 + $0x28] sm:$0xff]  }
 0x314   : > { %v1609_v16 = vpop.eup %1608 }
 0x315   : > { %v644_v17 = vmul.f32 %v642_v15, %v623_v4  ;;  %v643_v18 = vmul.f32 %v1609_v16, %v625_v6  ;;  %v1588_v15 = vld [vmem:[%s2007_s7 + $0x30] sm:$0xff]   ;;  %v1589_v16 = vld [vmem:[%s2007_s7 + $0x38] sm:$0xff]  }
 0x317   : > { %v645_v19 = vmul.f32 %v643_v18, %v627_v9  ;;  %v1582_v9 = vld [vmem:[%s2007_s7] sm:$0xff]  }
 0x319   : > { %v646_v20 = vpack.c.bf16 %v645_v19, %v644_v17 }
 0x31b   : > { %1454 = vmatmul.mubr.bf16.vlgmr.msra.gmra.mrb[4].mxu0 %v646_v20 }
 0x31c   : > { %1473 = vmatprep.mubr.msk.bf16.mxu0 %vm1659_vm0, %v1658_v1  ;;  %1458 = vmatpush3.bf16.msra.mxu0 %v1582_v9 }
 0x31d   : > { %1459 = vmatprep.subr.bf16.mxu0 %v1658_v1 }
 0x320   : > { %1460 = vmatpush3.bf16.msra.mxu0 %v1583_v10 }
 0x321   : > { %1461 = vmatprep.subr.bf16.mxu0 %v1658_v1 }
 0x324   : > { %1462 = vmatpush3.bf16.msra.mxu0 %v1584_v11 }
 0x325   : > { %1463 = vmatprep.subr.bf16.mxu0 %v1658_v1 }
 0x328   : > { %1464 = vmatpush3.bf16.msra.mxu0 %v1585_v12 }
 0x329   : > { %1465 = vmatprep.subr.bf16.mxu0 %v1658_v1 }
 0x32c   : > { %1466 = vmatpush3.bf16.msra.mxu0 %v1586_v13  ;;  %v1105_v13 = vsub.s32 6, %v1806_v42 }
 0x32d   : > { %1467 = vmatprep.subr.bf16.mxu0 %v1658_v1 }
 0x330   : > { %1468 = vmatpush3.bf16.msra.mxu0 %v1587_v14  ;;  %v1106_v14 = vrot.slane %v1812_v44, %v1105_v13 }
 0x331   : > { %1469 = vmatprep.subr.bf16.mxu0 %v1658_v1 }
 0x334   : > { %1470 = vmatpush3.bf16.msra.mxu0 %v1588_v15 }
 0x335   : > { %1471 = vmatprep.subr.bf16.mxu0 %v1658_v1 }
 0x338   : > { %1472 = vmatpush3.bf16.msra.mxu0 %v1589_v16 }
 0x3ee   : > { %v745_v21 = vpop.f32.mrb[4].mxu0 }
 0x3ef   : > { %v1852_v22 = vadd.f32 %v745_v21, %v1750_v5  ;;  %v1455_v23 = vpop.f32.mrb[5].mxu0  ;;  %v1563_v5 = vld [vmem:[%s2006_s6 + $0x14] ss:$8 sps:$4 sm:$0xff]  }
 0x3f0   : > { %v748_v24 = vpop.f32.mrb[6].mxu0  ;;  %887 = vmatprep.subr.bf16.mxu1 %v1563_v5 }
 0x3f1   : > { %v1855_v25 = vadd.f32 %v748_v24, %v1752_v8  ;;  %754 = vadd.xlane.f32.xlu0 %v1852_v22  ;;  %v1456_v26 = vpop.f32.mrb[7].mxu0  ;;  %v1561_v8 = vld [vmem:[%s2006_s6 + $0x10] ss:$8 sps:$4 sm:$0xff]  }
 0x3f2   : > { %888 = vmatpush1.bf16.msra.mxu1 %v1561_v8 }
 0x3f3   : > { %756 = vadd.xlane.f32.xlu1 %v1855_v25  ;;  %889 = vmatprep.subr.bf16.mxu1 %v1566_v37 }
 0x3f6   : > { %890 = vmatpush1.bf16.msra.mxu1 %v1564_v38 }
 0x3f7   : > { %891 = vmatprep.subr.bf16.mxu1 %v1569_v39 }
 0x3fa   : > { %892 = vmatpush1.bf16.msra.mxu1 %v1567_v40  ;;  %v1590_v40 = vld [vmem:[%s2008_s8] sm:$0xff]  }
 0x3fb   : > { %893 = vmatprep.subr.bf16.mxu1 %v1572_v41  ;;  %v1591_v41 = vld [vmem:[%s2008_s8 + $0x8] sm:$0xff]  }
 0x3fe   : > { %894 = vmatpush1.bf16.msra.mxu1 %v1570_v43 }
 0x3ff   : > { %895 = vmatprep.subr.bf16.mxu1 %v1575_v45 }
 0x402   : > { %896 = vmatpush1.bf16.msra.mxu1 %v1573_v46 }
 0x403   : > { %897 = vmatprep.subr.bf16.mxu1 %v1578_v47 }
 0x406   : > { %898 = vmatpush1.bf16.msra.mxu1 %v1576_v48 }
 0x407   : > { %899 = vmatprep.subr.bf16.mxu1 %v1581_v49 }
 0x40a   : > { %900 = vmatpush1.bf16.msra.mxu1 %v1579_v50  ;;  %v1592_v50 = vld [vmem:[%s2008_s8 + $0x10] sm:$0xff]  }
 0x40b   : > { %1477 = vmatprep.subr.bf16.mxu1 %v1658_v1 }
 0x47e   : > { %v755_v29 = vpop.xlane.xlu0 %754 }
 0x47f   : > { %v758_v30 = vmul.f32 0.0078125, %v755_v29 }
 0x480   : > { %v757_v31 = vpop.xlane.xlu1 %756 }
 0x481   : > { %v760_v32 = vsub.f32 %v1852_v22, %v758_v30  ;;  %v759_v33 = vmul.f32 0.0078125, %v757_v31 }
 0x483   : > { %v761_v34 = vsub.f32 %v1855_v25, %v759_v33  ;;  %v762_v35 = vmul.f32 %v760_v32, %v760_v32 }
 0x485   : > { %764 = vadd.xlane.f32.xlu0 %v762_v35  ;;  %v763_v36 = vmul.f32 %v761_v34, %v761_v34 }
 0x487   : > { %766 = vadd.xlane.f32.xlu1 %v763_v36 }
 0x512   : > { %v765_v51 = vpop.xlane.xlu0 %764 }
 0x513   : > { %v768_v52 = vmul.f32 0.0078125, %v765_v51  ;;  %v1593_v51 = vld [vmem:[%s2008_s8 + $0x18] sm:$0xff]  }
 0x514   : > { %v767_v53 = vpop.xlane.xlu1 %766 }
 0x515   : > { %v770_v54 = vadd.f32 1e-05, %v768_v52  ;;  %v769_v55 = vmul.f32 0.0078125, %v767_v53  ;;  %v1594_v52 = vld [vmem:[%s2008_s8 + $0x20] sm:$0xff]   ;;  %v1595_v53 = vld [vmem:[%s2008_s8 + $0x28] sm:$0xff]  }
 0x517   : > { %1610 = vrsqrt.f32 %v770_v54  ;;  %v771_v56 = vadd.f32 1e-05, %v769_v55  ;;  %v1596_v54 = vld [vmem:[%s2008_s8 + $0x30] sm:$0xff]   ;;  %v1597_v55 = vld [vmem:[%s2008_s8 + $0x38] sm:$0xff]  }
 0x519   : > { %1612 = vrsqrt.f32 %v771_v56 }
 0x521   : > { %v1611_v60 = vpop.eup %1610 }
 0x522   : > { %v774_v61 = vmul.f32 %v1611_v60, %v760_v32 }
 0x523   : > { %v1613_v62 = vpop.eup %1612 }
 0x524   : > { %v775_v63 = vmul.f32 %v1613_v62, %v761_v34  ;;  %v780_v0 = vmul.f32 %v779_v58, %v774_v61  ;;  %v1076_v62 = vsub.s32 4, %v1806_v42 }
 0x526   : > { %v781_v3 = vmul.f32 %v779_v58, %v775_v63  ;;  %v786_v4 = vadd.f32 %v785_v2, %v780_v0  ;;  %v1077_v63 = vrot.slane %v1812_v44, %v1076_v62  ;;  %v1082_v0 = vsub.s32 5, %v1806_v42 }
 0x528   : > { %v787_v6 = vadd.f32 %v785_v2, %v781_v3 }
 0x52a   : > { %v788_v7 = vpack.c.bf16 %v787_v6, %v786_v4 }
 0x52c   : > { %918 = vmatmul.mubr.bf16.vlgmr.msra.gmra.mrb[4].mxu1 %v788_v7  ;;  %v1083_v7 = vrot.slane %v1812_v44, %v1082_v0 }
 0x52d   : > { %1493 = vmatprep.mubr.msk.bf16.mxu1 %vm1659_vm0, %v1658_v1  ;;  %1478 = vmatpush3.bf16.msra.mxu1 %v1590_v40 }
 0x52e   : > { %1479 = vmatprep.subr.bf16.mxu1 %v1658_v1 }
 0x531   : > { %1480 = vmatpush3.bf16.msra.mxu1 %v1591_v41 }
 0x532   : > { %1481 = vmatprep.subr.bf16.mxu1 %v1658_v1 }
 0x535   : > { %1482 = vmatpush3.bf16.msra.mxu1 %v1592_v50 }
 0x536   : > { %1483 = vmatprep.subr.bf16.mxu1 %v1658_v1 }
 0x539   : > { %1484 = vmatpush3.bf16.msra.mxu1 %v1593_v51 }
 0x53a   : > { %1485 = vmatprep.subr.bf16.mxu1 %v1658_v1 }
 0x53d   : > { %1486 = vmatpush3.bf16.msra.mxu1 %v1594_v52 }
 0x53e   : > { %1487 = vmatprep.subr.bf16.mxu1 %v1658_v1 }
 0x541   : > { %1488 = vmatpush3.bf16.msra.mxu1 %v1595_v53 }
 0x542   : > { %1489 = vmatprep.subr.bf16.mxu1 %v1658_v1 }
 0x545   : > { %1490 = vmatpush3.bf16.msra.mxu1 %v1596_v54 }
 0x546   : > { %1491 = vmatprep.subr.bf16.mxu1 %v1658_v1 }
 0x549   : > { %1492 = vmatpush3.bf16.msra.mxu1 %v1597_v55 }
 0x5ff   : > { %v919_v17 = vpop.f32.mrb[4].mxu1 }
 0x600   : > { %v1369_v18 = vmul.f32 -1.442695, %v919_v17  ;;  %v921_v19 = vpop.f32.mrb[5].mxu1 }
 0x601   : > { %v923_v20 = vpop.f32.mrb[6].mxu1 }
 0x602   : > { %1614 = vpow2.f32 %v1369_v18  ;;  %v1370_v21 = vmul.f32 -1.442695, %v923_v20  ;;  %v925_v23 = vpop.f32.mrb[7].mxu1 }
 0x604   : > { %1616 = vpow2.f32 %v1370_v21 }
 0x60c   : > { %v1615_v24 = vpop.eup %1614 }
 0x60d   : > { %v934_v26 = vadd.f32 1.0, %v1615_v24 }
 0x60e   : > { %v1617_v27 = vpop.eup %1616 }
 0x60f   : > { %1618 = vrcp.f32 %v934_v26  ;;  %v935_v28 = vadd.f32 1.0, %v1617_v27 }
 0x611   : > { %1620 = vrcp.f32 %v935_v28 }
 0x619   : > { %v1619_v5 = vpop.eup %1618 }
 0x61a   : > { %v940_v8 = vmul.f32 %v1619_v5, %v919_v17 }
 0x61b   : > { %v1621_v29 = vpop.eup %1620 }
 0x61c   : > { %v942_v30 = vmul.f32 %v940_v8, %v921_v19  ;;  %v941_v31 = vmul.f32 %v1621_v29, %v923_v20 }
 0x61e   : > { %v943_v32 = vmul.f32 %v941_v31, %v925_v23 }
 0x620   : > { %v944_v33 = vpack.c.bf16 %v943_v32, %v942_v30 }
 0x622   : > { %1474 = vmatmul.mubr.bf16.vlgmr.msra.gmra.mrb[8].mxu0 %v944_v33 }
 0x6f5   : > { %v1043_v34 = vpop.f32.mrb[8].mxu0 }
 0x6f6   : > { %v1050_v35 = vadd.f32 %v1043_v34, %v1852_v22  ;;  %v1475_v36 = vpop.f32.mrb[9].mxu0 }
 0x6f7   : > { %v1046_v37 = vpop.f32.mrb[10].mxu0 }
 0x6f8   : > { %v1051_v38 = vadd.f32 %v1046_v37, %v1855_v25  ;;  %1052 = vadd.xlane.f32.xlu0 %v1050_v35  ;;  %v1476_v39 = vpop.f32.mrb[11].mxu0 }
 0x6fa   : > { %1054 = vadd.xlane.f32.xlu1 %v1051_v38 }
 0x785   : > { %v1053_v22 = vpop.xlane.xlu0 %1052 }
 0x786   : > { %v1056_v43 = vmul.f32 0.0078125, %v1053_v22 }
 0x787   : > { %v1055_v25 = vpop.xlane.xlu1 %1054 }
 0x788   : > { %v1058_v45 = vsub.f32 %v1050_v35, %v1056_v43  ;;  %v1057_v46 = vmul.f32 0.0078125, %v1055_v25 }
 0x78a   : > { %v1059_v47 = vsub.f32 %v1051_v38, %v1057_v46  ;;  %v1060_v48 = vmul.f32 %v1058_v45, %v1058_v45 }
 0x78c   : > { %1062 = vadd.xlane.f32.xlu0 %v1060_v48  ;;  %v1061_v49 = vmul.f32 %v1059_v47, %v1059_v47 }
 0x78e   : > { %1064 = vadd.xlane.f32.xlu1 %v1061_v49 }
 0x819   : > { %v1063_v56 = vpop.xlane.xlu0 %1062 }
 0x81a   : > { %v1066_v57 = vmul.f32 0.0078125, %v1063_v56 }
 0x81b   : > { %v1065_v58 = vpop.xlane.xlu1 %1064 }
 0x81c   : > { %v1068_v59 = vadd.f32 1e-05, %v1066_v57  ;;  %v1067_v60 = vmul.f32 0.0078125, %v1065_v58 }
 0x81e   : > { %1622 = vrsqrt.f32 %v1068_v59  ;;  %v1069_v61 = vadd.f32 1e-05, %v1067_v60 }
 0x820   : > { %1624 = vrsqrt.f32 %v1069_v61 }
 0x828   : > { %v1623_v2 = vpop.eup %1622 }
 0x829   : > { %v1072_v3 = vmul.f32 %v1623_v2, %v1058_v45 }
 0x82a   : > { %v1625_v4 = vpop.eup %1624 }
 0x82b   : > { %v1073_v6 = vmul.f32 %v1625_v4, %v1059_v47  ;;  %v1078_v1 = vmul.f32 %v1077_v63, %v1072_v3 }
 0x82d   : > { %v1079_v9 = vmul.f32 %v1077_v63, %v1073_v6  ;;  %v1084_v10 = vadd.f32 %v1083_v7, %v1078_v1 }
 0x82f   : > { %v1085_v11 = vadd.f32 %v1083_v7, %v1079_v9 }
 0x831   : > { %v1086_v12 = vpack.c.bf16 %v1085_v11, %v1084_v10 }
 0x833   : > { %1494 = vmatmul.mubr.bf16.vlgmr.msra.gmra.mrb[8].mxu1 %v1086_v12 }
 0x906   : > { %v1189_v15 = vpop.f32.mrb[8].mxu1 }
 0x907   : > { %v1190_v16 = vadd.f32 %v1189_v15, %v1106_v14  ;;  %v1495_v17 = vpop.f32.mrb[9].mxu1 }
 0x908   : > { %v1192_v18 = vpop.f32.mrb[10].mxu1 }
 0x909   : > { %v1387_v19 = vmul.f32 -1.442695, %v1190_v16  ;;  %v1193_v20 = vadd.f32 %v1192_v18, %v1106_v14  ;;  %v1496_v21 = vpop.f32.mrb[11].mxu1 }
 0x90b   : > { %1626 = vpow2.f32 %v1387_v19  ;;  %v1388_v23 = vmul.f32 -1.442695, %v1193_v20 }
 0x90d   : > { %1628 = vpow2.f32 %v1388_v23 }
 0x915   : > { %v1627_v24 = vpop.eup %1626 }
 0x916   : > { %v1202_v26 = vadd.f32 1.0, %v1627_v24 }
 0x917   : > { %v1629_v27 = vpop.eup %1628 }
 0x918   : > { %v1203_v28 = vadd.f32 1.0, %v1629_v27  ;;  %1630 = vrcp.f32 %v1202_v26 }
 0x91a   : > { %1632 = vrcp.f32 %v1203_v28 }
 0x922   : > { %v1631_v42 = vpop.eup %1630 }
 0x924   : > { %v1633_v5 = vpop.eup %1632 }
 0x925   : > { %v1400_v44 = vpack.c.bf16 %v1633_v5, %v1631_v42 }
 0x927   : > { %1401 = vst [vmem:[%s384_s26] sm:$0xff] %v1400_v44  }
 0x928 PF: > { %s19_s11 = sadd.s32 1, %s1656_s11   ;;  %s2010_s30 = smov %s1652_s10 }
 0x929   : > { %p16_p5 = scmp.ge.s32.totalorder %s19_s11, 4   ;;  %s2011_s10 = smov %s2013_s12 }
 0x92b   :  { %18 = sbr.rel (!%p16_p5) target bundleno = 2 (0x2), region = 89 }

</bundles_post_ra>
